<compile_context>
chip_gen: v7x
topology: tpu7x:2x2x1
jax: 0.10.0
libtpu: 0.0.40
codegen_flags: <defaults>
</compile_context>

<pallas_src>
import jax
import jax.numpy as jnp
from jax.experimental import pallas as pl
from jax.experimental.pallas import tpu as pltpu


def _round_up(x, m):
    return (x + m - 1) // m * m


def circle_conv(x_nchw, weight, bias, *, compute_dtype=jnp.bfloat16):
    """x_nchw: (N, Cin, H, W); weight: (9, Cout, Cin); bias: (Cout,)
    -> (N, Cout, H-4, W-4), matching F.conv2d with the centered 3x3-in-5x5 kernel."""
    N, Cin, H, W = x_nchw.shape
    _, Cout, _ = weight.shape
    OH, OW = H - 4, W - 4
    HW = H * W
    OHW = OH * W                        # output rows kept at full-W stride in-kernel

    # Alignment padding (review: sublane-multiple channels, lane-dense output).
    Cin_p = _round_up(Cin, 8)
    Cout_p = _round_up(Cout, 8)
    OHW_pad = _round_up(OHW, 128)       # kernel output lane width (192 -> 256 here)
    # Tap slices read [start, start + OHW_pad); the largest start is 3*W + 3.
    HW_pad = _round_up(max(HW, 3 * W + 3 + OHW_pad), 128)

    # One fused pad+cast pass over the input (row-major reshape is free).
    x_flat = x_nchw.reshape(N, Cin, HW)
    x_p = jnp.pad(x_flat, ((0, 0), (0, Cin_p - Cin), (0, HW_pad - HW))).astype(compute_dtype)
    w_p = jnp.pad(weight, ((0, 0), (0, Cout_p - Cout), (0, Cin_p - Cin))).astype(compute_dtype)
    b_p = jnp.pad(bias, (0, Cout_p - Cout)).reshape(Cout_p, 1).astype(jnp.float32)

    # Batch tile: largest divisor of N whose double-buffered per-step footprint
    # stays comfortably inside every generation's default scoped VMEM.
    in_bytes = Cin_p * HW_pad * jnp.dtype(compute_dtype).itemsize
    out_bytes = Cout_p * OHW_pad * jnp.dtype(x_nchw.dtype).itemsize
    per_sample = 2 * (in_bytes + out_bytes)          # double-buffered in + out blocks
    budget = 24 * 1024 * 1024
    Nb = 1
    for d in range(1, N + 1):
        if N % d == 0 and d * per_sample <= budget:
            Nb = d

    out_dtype = x_nchw.dtype

    def kernel(x_ref, w_ref, b_ref, o_ref):
        # x_ref: (Nb, Cin_p, HW_pad) bf16   w_ref: (9, Cout_p, Cin_p) bf16
        # b_ref: (Cout_p, 1) f32            o_ref: (Nb, Cout_p, OHW_pad)
        # Hoisted once (JAX does not CSE broadcast_in_dim / repeated tiny loads).
        bias_bc = jnp.broadcast_to(b_ref[...], (Cout_p, OHW_pad))      # f32 acc init
        w_taps = [w_ref[t] for t in range(9)]                           # 9 x (Cout_p, Cin_p)

        for n in range(Nb):                                             # static unroll
            xn = x_ref[n]                                               # (Cin_p, HW_pad), one load
            acc = bias_bc                                               # f32 accumulator
            for t in range(9):
                dh, dw = divmod(t, 3)
                start = (1 + dh) * W + (1 + dw)                         # static lane offset
                x_tap = xn[:, start:start + OHW_pad]                    # (Cin_p, OHW_pad)
                acc = acc + jax.lax.dot_general(                        # MXU, f32 accumulate
                    w_taps[t], x_tap,
                    dimension_numbers=(((1,), (0,)), ((), ())),
                    preferred_element_type=jnp.float32)
            o_ref[n] = acc.astype(o_ref.dtype)                          # lane-dense store

    footprint = Nb * per_sample + 2 * (w_p.size * w_p.dtype.itemsize) + 4 * Cout_p
    params = dict(dimension_semantics=("parallel",))
    if footprint > 12 * 1024 * 1024:
        # Raise the scoped-VMEM limit only when the blocks actually need it
        # (default scoped limit: 16 MiB v5e / 32 MiB v6e, v7x).
        params["vmem_limit_bytes"] = min(int(1.5 * footprint), 96 * 1024 * 1024)

    out_flat = pl.pallas_call(
        kernel,
        out_shape=jax.ShapeDtypeStruct((N, Cout_p, OHW_pad), out_dtype),
        grid=(N // Nb,),
        in_specs=[
            pl.BlockSpec((Nb, Cin_p, HW_pad), lambda i: (i, 0, 0)),
            pl.BlockSpec((9, Cout_p, Cin_p), lambda i: (0, 0, 0)),
            pl.BlockSpec((Cout_p, 1), lambda i: (0, 0)),
        ],
        out_specs=pl.BlockSpec((Nb, Cout_p, OHW_pad), lambda i: (i, 0, 0)),
        compiler_params=pltpu.CompilerParams(**params),
    )(x_p, w_p, b_p)

    # Valid-region extraction (free reshape + one small strided slice): columns
    # ow in [OW, W) are the full-W-stride padding of the im2col layout and the
    # channel/lane pads are dropped.  For large outputs, keep the padded layout
    # and fuse this crop into the consumer instead.
    out = out_flat[:, :Cout, :OHW].reshape(N, Cout, OH, W)[:, :, :, :OW]
    return out


def _reference(x_nchw, weight, bias, dtype=jnp.float32):
    """Pure-JAX reference: 3x3 kernel on the inner crop == centered 3x3-in-5x5,
    padding=0.  `dtype` controls operand precision (accumulation is f32)."""
    _, Cout, Cin = weight.shape
    w3 = jnp.transpose(weight, (1, 2, 0)).reshape(Cout, Cin, 3, 3).astype(dtype)   # OIHW
    x_crop = x_nchw[:, :, 1:-1, 1:-1].astype(dtype)
    out = jax.lax.conv_general_dilated(
        x_crop, w3, window_strides=(1, 1), padding="VALID",
        dimension_numbers=("NCHW", "OIHW", "NCHW"),
        preferred_element_type=jnp.float32)
    return out + bias[None, :, None, None].astype(jnp.float32)


if __name__ == "__main__":
    key = jax.random.PRNGKey(0)
    k_x, k_w, k_b = jax.random.split(key, 3)

    N, Cin, Cout, H, W = 2, 4, 8, 16, 16

    x = jax.random.normal(k_x, (N, Cin, H, W), dtype=jnp.float32)

    # Kaiming-normal-style init: std = sqrt(2 / fan_in), fan_in = Cout * Cin for a
    # (9, Cout, Cin) tensor (PyTorch convention).  Non-zero bias to exercise the
    # bias-folding path (the module's Parameter would be non-zero after training).
    fan_in = Cout * Cin
    weight = jax.random.normal(k_w, (9, Cout, Cin), dtype=jnp.float32) * jnp.sqrt(2.0 / fan_in)
    bias = 0.1 * jax.random.normal(k_b, (Cout,), dtype=jnp.float32)

    out = jax.block_until_ready(circle_conv(x, weight, bias))
    assert out.shape == (N, Cout, H - 4, W - 4), out.shape

    # Tight check vs. a reference with the same bf16 operand rounding (f32 accum).
    ref_bf16 = _reference(x, weight, bias, dtype=jnp.bfloat16)
    err_bf16 = float(jnp.max(jnp.abs(out - ref_bf16)))
    assert jnp.allclose(out, ref_bf16, atol=1e-4, rtol=1e-4), err_bf16

    # Sanity check vs. the full-f32 reference (bf16-operand tolerance).
    ref_f32 = _reference(x, weight, bias, dtype=jnp.float32)
    err_f32 = float(jnp.max(jnp.abs(out - ref_f32)))
    assert jnp.allclose(out, ref_f32, atol=5e-2, rtol=5e-2), err_f32

    print("KERNEL_OK")
</pallas_src>

<mosaic_0001>
module attributes {stable_mosaic.version = 11 : i64} {
  func.func @kernel(%arg0: i32, %arg1: memref<2x8x384xbf16, #tpu.memory_space<vmem>>, %arg2: memref<9x8x8xbf16, #tpu.memory_space<vmem>>, %arg3: memref<8x1xf32, #tpu.memory_space<vmem>>, %arg4: memref<2x8x256xf32, #tpu.memory_space<vmem>>) attributes {dimension_semantics = [#tpu.dimension_semantics<parallel>], iteration_bounds = array<i64: 1>, scalar_prefetch = 0 : i64, scratch_operands = 0 : i64, tpu.core_type = #tpu.core_type<tc>, window_params = [{transform_indices = @transform_0, window_bounds = array<i64: 2, 8, 384>}, {pipeline_mode = #tpu.pipeline_mode<synchronous>, transform_indices = @transform_1, window_bounds = array<i64: 9, 8, 8>}, {pipeline_mode = #tpu.pipeline_mode<synchronous>, transform_indices = @transform_2, window_bounds = array<i64: 8, 1>}, {transform_indices = @transform_3, window_bounds = array<i64: 2, 8, 256>}]} {
    %c0 = arith.constant 0 : index
    %c0_0 = arith.constant 0 : index
    %0 = vector.load %arg3[%c0, %c0_0] : memref<8x1xf32, #tpu.memory_space<vmem>>, vector<8x1xf32>
    %1 = vector.shape_cast %0 : vector<8x1xf32> to vector<8x1xf32>
    %2 = vector.broadcast %1 : vector<8x1xf32> to vector<8x256xf32>
    %c0_1 = arith.constant 0 : index
    %c0_2 = arith.constant 0 : index
    %c0_3 = arith.constant 0 : index
    %3 = vector.load %arg2[%c0_1, %c0_2, %c0_3] : memref<9x8x8xbf16, #tpu.memory_space<vmem>>, vector<1x8x8xbf16>
    %4 = vector.shape_cast %3 : vector<1x8x8xbf16> to vector<8x8xbf16>
    %c1 = arith.constant 1 : index
    %c0_4 = arith.constant 0 : index
    %c0_5 = arith.constant 0 : index
    %5 = vector.load %arg2[%c1, %c0_4, %c0_5] : memref<9x8x8xbf16, #tpu.memory_space<vmem>>, vector<1x8x8xbf16>
    %6 = vector.shape_cast %5 : vector<1x8x8xbf16> to vector<8x8xbf16>
    %c2 = arith.constant 2 : index
    %c0_6 = arith.constant 0 : index
    %c0_7 = arith.constant 0 : index
    %7 = vector.load %arg2[%c2, %c0_6, %c0_7] : memref<9x8x8xbf16, #tpu.memory_space<vmem>>, vector<1x8x8xbf16>
    %8 = vector.shape_cast %7 : vector<1x8x8xbf16> to vector<8x8xbf16>
    %c3 = arith.constant 3 : index
    %c0_8 = arith.constant 0 : index
    %c0_9 = arith.constant 0 : index
    %9 = vector.load %arg2[%c3, %c0_8, %c0_9] : memref<9x8x8xbf16, #tpu.memory_space<vmem>>, vector<1x8x8xbf16>
    %10 = vector.shape_cast %9 : vector<1x8x8xbf16> to vector<8x8xbf16>
    %c4 = arith.constant 4 : index
    %c0_10 = arith.constant 0 : index
    %c0_11 = arith.constant 0 : index
    %11 = vector.load %arg2[%c4, %c0_10, %c0_11] : memref<9x8x8xbf16, #tpu.memory_space<vmem>>, vector<1x8x8xbf16>
    %12 = vector.shape_cast %11 : vector<1x8x8xbf16> to vector<8x8xbf16>
    %c5 = arith.constant 5 : index
    %c0_12 = arith.constant 0 : index
    %c0_13 = arith.constant 0 : index
    %13 = vector.load %arg2[%c5, %c0_12, %c0_13] : memref<9x8x8xbf16, #tpu.memory_space<vmem>>, vector<1x8x8xbf16>
    %14 = vector.shape_cast %13 : vector<1x8x8xbf16> to vector<8x8xbf16>
    %c6 = arith.constant 6 : index
    %c0_14 = arith.constant 0 : index
    %c0_15 = arith.constant 0 : index
    %15 = vector.load %arg2[%c6, %c0_14, %c0_15] : memref<9x8x8xbf16, #tpu.memory_space<vmem>>, vector<1x8x8xbf16>
    %16 = vector.shape_cast %15 : vector<1x8x8xbf16> to vector<8x8xbf16>
    %c7 = arith.constant 7 : index
    %c0_16 = arith.constant 0 : index
    %c0_17 = arith.constant 0 : index
    %17 = vector.load %arg2[%c7, %c0_16, %c0_17] : memref<9x8x8xbf16, #tpu.memory_space<vmem>>, vector<1x8x8xbf16>
    %18 = vector.shape_cast %17 : vector<1x8x8xbf16> to vector<8x8xbf16>
    %c8 = arith.constant 8 : index
    %c0_18 = arith.constant 0 : index
    %c0_19 = arith.constant 0 : index
    %19 = vector.load %arg2[%c8, %c0_18, %c0_19] : memref<9x8x8xbf16, #tpu.memory_space<vmem>>, vector<1x8x8xbf16>
    %20 = vector.shape_cast %19 : vector<1x8x8xbf16> to vector<8x8xbf16>
    %c0_20 = arith.constant 0 : index
    %c0_21 = arith.constant 0 : index
    %c0_22 = arith.constant 0 : index
    %21 = vector.load %arg1[%c0_20, %c0_21, %c0_22] : memref<2x8x384xbf16, #tpu.memory_space<vmem>>, vector<1x8x384xbf16>
    %22 = vector.shape_cast %21 : vector<1x8x384xbf16> to vector<8x384xbf16>
    %23 = vector.extract_strided_slice %22 {offsets = [0, 17], sizes = [8, 256], strides = [1, 1]} : vector<8x384xbf16> to vector<8x256xbf16>
    %cst = arith.constant dense<0.000000e+00> : vector<8x256xf32>
    %24 = tpu.matmul %4, %23, %cst {dimension_numbers = #tpu.dot_dimension_numbers<[1], [0], [0], [1], [0, 0, 1, 1], [], []>} : vector<8x8xbf16>, vector<8x256xbf16>, vector<8x256xf32> -> vector<8x256xf32>
    %25 = arith.addf %2, %24 : vector<8x256xf32>
    %26 = vector.extract_strided_slice %22 {offsets = [0, 18], sizes = [8, 256], strides = [1, 1]} : vector<8x384xbf16> to vector<8x256xbf16>
    %cst_23 = arith.constant dense<0.000000e+00> : vector<8x256xf32>
    %27 = tpu.matmul %6, %26, %cst_23 {dimension_numbers = #tpu.dot_dimension_numbers<[1], [0], [0], [1], [0, 0, 1, 1], [], []>} : vector<8x8xbf16>, vector<8x256xbf16>, vector<8x256xf32> -> vector<8x256xf32>
    %28 = arith.addf %25, %27 : vector<8x256xf32>
    %29 = vector.extract_strided_slice %22 {offsets = [0, 19], sizes = [8, 256], strides = [1, 1]} : vector<8x384xbf16> to vector<8x256xbf16>
    %cst_24 = arith.constant dense<0.000000e+00> : vector<8x256xf32>
    %30 = tpu.matmul %8, %29, %cst_24 {dimension_numbers = #tpu.dot_dimension_numbers<[1], [0], [0], [1], [0, 0, 1, 1], [], []>} : vector<8x8xbf16>, vector<8x256xbf16>, vector<8x256xf32> -> vector<8x256xf32>
    %31 = arith.addf %28, %30 : vector<8x256xf32>
    %32 = vector.extract_strided_slice %22 {offsets = [0, 33], sizes = [8, 256], strides = [1, 1]} : vector<8x384xbf16> to vector<8x256xbf16>
    %cst_25 = arith.constant dense<0.000000e+00> : vector<8x256xf32>
    %33 = tpu.matmul %10, %32, %cst_25 {dimension_numbers = #tpu.dot_dimension_numbers<[1], [0], [0], [1], [0, 0, 1, 1], [], []>} : vector<8x8xbf16>, vector<8x256xbf16>, vector<8x256xf32> -> vector<8x256xf32>
    %34 = arith.addf %31, %33 : vector<8x256xf32>
    %35 = vector.extract_strided_slice %22 {offsets = [0, 34], sizes = [8, 256], strides = [1, 1]} : vector<8x384xbf16> to vector<8x256xbf16>
    %cst_26 = arith.constant dense<0.000000e+00> : vector<8x256xf32>
    %36 = tpu.matmul %12, %35, %cst_26 {dimension_numbers = #tpu.dot_dimension_numbers<[1], [0], [0], [1], [0, 0, 1, 1], [], []>} : vector<8x8xbf16>, vector<8x256xbf16>, vector<8x256xf32> -> vector<8x256xf32>
    %37 = arith.addf %34, %36 : vector<8x256xf32>
    %38 = vector.extract_strided_slice %22 {offsets = [0, 35], sizes = [8, 256], strides = [1, 1]} : vector<8x384xbf16> to vector<8x256xbf16>
    %cst_27 = arith.constant dense<0.000000e+00> : vector<8x256xf32>
    %39 = tpu.matmul %14, %38, %cst_27 {dimension_numbers = #tpu.dot_dimension_numbers<[1], [0], [0], [1], [0, 0, 1, 1], [], []>} : vector<8x8xbf16>, vector<8x256xbf16>, vector<8x256xf32> -> vector<8x256xf32>
    %40 = arith.addf %37, %39 : vector<8x256xf32>
    %41 = vector.extract_strided_slice %22 {offsets = [0, 49], sizes = [8, 256], strides = [1, 1]} : vector<8x384xbf16> to vector<8x256xbf16>
    %cst_28 = arith.constant dense<0.000000e+00> : vector<8x256xf32>
    %42 = tpu.matmul %16, %41, %cst_28 {dimension_numbers = #tpu.dot_dimension_numbers<[1], [0], [0], [1], [0, 0, 1, 1], [], []>} : vector<8x8xbf16>, vector<8x256xbf16>, vector<8x256xf32> -> vector<8x256xf32>
    %43 = arith.addf %40, %42 : vector<8x256xf32>
    %44 = vector.extract_strided_slice %22 {offsets = [0, 50], sizes = [8, 256], strides = [1, 1]} : vector<8x384xbf16> to vector<8x256xbf16>
    %cst_29 = arith.constant dense<0.000000e+00> : vector<8x256xf32>
    %45 = tpu.matmul %18, %44, %cst_29 {dimension_numbers = #tpu.dot_dimension_numbers<[1], [0], [0], [1], [0, 0, 1, 1], [], []>} : vector<8x8xbf16>, vector<8x256xbf16>, vector<8x256xf32> -> vector<8x256xf32>
    %46 = arith.addf %43, %45 : vector<8x256xf32>
    %47 = vector.extract_strided_slice %22 {offsets = [0, 51], sizes = [8, 256], strides = [1, 1]} : vector<8x384xbf16> to vector<8x256xbf16>
    %cst_30 = arith.constant dense<0.000000e+00> : vector<8x256xf32>
    %48 = tpu.matmul %20, %47, %cst_30 {dimension_numbers = #tpu.dot_dimension_numbers<[1], [0], [0], [1], [0, 0, 1, 1], [], []>} : vector<8x8xbf16>, vector<8x256xbf16>, vector<8x256xf32> -> vector<8x256xf32>
    %49 = arith.addf %46, %48 : vector<8x256xf32>
    %c0_31 = arith.constant 0 : index
    %c0_32 = arith.constant 0 : index
    %c0_33 = arith.constant 0 : index
    %50 = vector.load %arg4[%c0_31, %c0_32, %c0_33] : memref<2x8x256xf32, #tpu.memory_space<vmem>>, vector<1x8x256xf32>
    %51 = vector.shape_cast %50 : vector<1x8x256xf32> to vector<8x256xf32>
    %52 = vector.shape_cast %49 : vector<8x256xf32> to vector<1x8x256xf32>
    tpu.vector_store %arg4[%c0_31, %c0_32, %c0_33], %52 {strides = array<i32>} : memref<2x8x256xf32, #tpu.memory_space<vmem>>, vector<1x8x256xf32>,
    %c1_34 = arith.constant 1 : index
    %c0_35 = arith.constant 0 : index
    %c0_36 = arith.constant 0 : index
    %53 = vector.load %arg1[%c1_34, %c0_35, %c0_36] : memref<2x8x384xbf16, #tpu.memory_space<vmem>>, vector<1x8x384xbf16>
    %54 = vector.shape_cast %53 : vector<1x8x384xbf16> to vector<8x384xbf16>
    %55 = vector.extract_strided_slice %54 {offsets = [0, 17], sizes = [8, 256], strides = [1, 1]} : vector<8x384xbf16> to vector<8x256xbf16>
    %cst_37 = arith.constant dense<0.000000e+00> : vector<8x256xf32>
    %56 = tpu.matmul %4, %55, %cst_37 {dimension_numbers = #tpu.dot_dimension_numbers<[1], [0], [0], [1], [0, 0, 1, 1], [], []>} : vector<8x8xbf16>, vector<8x256xbf16>, vector<8x256xf32> -> vector<8x256xf32>
    %57 = arith.addf %2, %56 : vector<8x256xf32>
    %58 = vector.extract_strided_slice %54 {offsets = [0, 18], sizes = [8, 256], strides = [1, 1]} : vector<8x384xbf16> to vector<8x256xbf16>
    %cst_38 = arith.constant dense<0.000000e+00> : vector<8x256xf32>
    %59 = tpu.matmul %6, %58, %cst_38 {dimension_numbers = #tpu.dot_dimension_numbers<[1], [0], [0], [1], [0, 0, 1, 1], [], []>} : vector<8x8xbf16>, vector<8x256xbf16>, vector<8x256xf32> -> vector<8x256xf32>
    %60 = arith.addf %57, %59 : vector<8x256xf32>
    %61 = vector.extract_strided_slice %54 {offsets = [0, 19], sizes = [8, 256], strides = [1, 1]} : vector<8x384xbf16> to vector<8x256xbf16>
    %cst_39 = arith.constant dense<0.000000e+00> : vector<8x256xf32>
    %62 = tpu.matmul %8, %61, %cst_39 {dimension_numbers = #tpu.dot_dimension_numbers<[1], [0], [0], [1], [0, 0, 1, 1], [], []>} : vector<8x8xbf16>, vector<8x256xbf16>, vector<8x256xf32> -> vector<8x256xf32>
    %63 = arith.addf %60, %62 : vector<8x256xf32>
    %64 = vector.extract_strided_slice %54 {offsets = [0, 33], sizes = [8, 256], strides = [1, 1]} : vector<8x384xbf16> to vector<8x256xbf16>
    %cst_40 = arith.constant dense<0.000000e+00> : vector<8x256xf32>
    %65 = tpu.matmul %10, %64, %cst_40 {dimension_numbers = #tpu.dot_dimension_numbers<[1], [0], [0], [1], [0, 0, 1, 1], [], []>} : vector<8x8xbf16>, vector<8x256xbf16>, vector<8x256xf32> -> vector<8x256xf32>
    %66 = arith.addf %63, %65 : vector<8x256xf32>
    %67 = vector.extract_strided_slice %54 {offsets = [0, 34], sizes = [8, 256], strides = [1, 1]} : vector<8x384xbf16> to vector<8x256xbf16>
    %cst_41 = arith.constant dense<0.000000e+00> : vector<8x256xf32>
    %68 = tpu.matmul %12, %67, %cst_41 {dimension_numbers = #tpu.dot_dimension_numbers<[1], [0], [0], [1], [0, 0, 1, 1], [], []>} : vector<8x8xbf16>, vector<8x256xbf16>, vector<8x256xf32> -> vector<8x256xf32>
    %69 = arith.addf %66, %68 : vector<8x256xf32>
    %70 = vector.extract_strided_slice %54 {offsets = [0, 35], sizes = [8, 256], strides = [1, 1]} : vector<8x384xbf16> to vector<8x256xbf16>
    %cst_42 = arith.constant dense<0.000000e+00> : vector<8x256xf32>
    %71 = tpu.matmul %14, %70, %cst_42 {dimension_numbers = #tpu.dot_dimension_numbers<[1], [0], [0], [1], [0, 0, 1, 1], [], []>} : vector<8x8xbf16>, vector<8x256xbf16>, vector<8x256xf32> -> vector<8x256xf32>
    %72 = arith.addf %69, %71 : vector<8x256xf32>
    %73 = vector.extract_strided_slice %54 {offsets = [0, 49], sizes = [8, 256], strides = [1, 1]} : vector<8x384xbf16> to vector<8x256xbf16>
    %cst_43 = arith.constant dense<0.000000e+00> : vector<8x256xf32>
    %74 = tpu.matmul %16, %73, %cst_43 {dimension_numbers = #tpu.dot_dimension_numbers<[1], [0], [0], [1], [0, 0, 1, 1], [], []>} : vector<8x8xbf16>, vector<8x256xbf16>, vector<8x256xf32> -> vector<8x256xf32>
    %75 = arith.addf %72, %74 : vector<8x256xf32>
    %76 = vector.extract_strided_slice %54 {offsets = [0, 50], sizes = [8, 256], strides = [1, 1]} : vector<8x384xbf16> to vector<8x256xbf16>
    %cst_44 = arith.constant dense<0.000000e+00> : vector<8x256xf32>
    %77 = tpu.matmul %18, %76, %cst_44 {dimension_numbers = #tpu.dot_dimension_numbers<[1], [0], [0], [1], [0, 0, 1, 1], [], []>} : vector<8x8xbf16>, vector<8x256xbf16>, vector<8x256xf32> -> vector<8x256xf32>
    %78 = arith.addf %75, %77 : vector<8x256xf32>
    %79 = vector.extract_strided_slice %54 {offsets = [0, 51], sizes = [8, 256], strides = [1, 1]} : vector<8x384xbf16> to vector<8x256xbf16>
    %cst_45 = arith.constant dense<0.000000e+00> : vector<8x256xf32>
    %80 = tpu.matmul %20, %79, %cst_45 {dimension_numbers = #tpu.dot_dimension_numbers<[1], [0], [0], [1], [0, 0, 1, 1], [], []>} : vector<8x8xbf16>, vector<8x256xbf16>, vector<8x256xf32> -> vector<8x256xf32>
    %81 = arith.addf %78, %80 : vector<8x256xf32>
    %c1_46 = arith.constant 1 : index
    %c0_47 = arith.constant 0 : index
    %c0_48 = arith.constant 0 : index
    %82 = vector.load %arg4[%c1_46, %c0_47, %c0_48] : memref<2x8x256xf32, #tpu.memory_space<vmem>>, vector<1x8x256xf32>
    %83 = vector.shape_cast %82 : vector<1x8x256xf32> to vector<8x256xf32>
    %84 = vector.shape_cast %81 : vector<8x256xf32> to vector<1x8x256xf32>
    tpu.vector_store %arg4[%c1_46, %c0_47, %c0_48], %84 {strides = array<i32>} : memref<2x8x256xf32, #tpu.memory_space<vmem>>, vector<1x8x256xf32>,
    return
  }
  func.func @transform_0(%arg0: i32) -> (i32, i32, i32) {
    %c0_i32 = arith.constant 0 : i32
    %c0_i32_0 = arith.constant 0 : i32
    %c0_i32_1 = arith.constant 0 : i32
    return %arg0, %c0_i32, %c0_i32_0 : i32, i32, i32
  }
  func.func @transform_1(%arg0: i32) -> (i32, i32, i32) {
    %c0_i32 = arith.constant 0 : i32
    %c0_i32_0 = arith.constant 0 : i32
    %c0_i32_1 = arith.constant 0 : i32
    %c0_i32_2 = arith.constant 0 : i32
    return %c0_i32, %c0_i32_0, %c0_i32_1 : i32, i32, i32
  }
  func.func @transform_2(%arg0: i32) -> (i32, i32) {
    %c0_i32 = arith.constant 0 : i32
    %c0_i32_0 = arith.constant 0 : i32
    %c0_i32_1 = arith.constant 0 : i32
    return %c0_i32, %c0_i32_0 : i32, i32
  }
  func.func @transform_3(%arg0: i32) -> (i32, i32, i32) {
    %c0_i32 = arith.constant 0 : i32
    %c0_i32_0 = arith.constant 0 : i32
    %c0_i32_1 = arith.constant 0 : i32
    return %arg0, %c0_i32, %c0_i32_0 : i32, i32, i32
  }
}

</mosaic_0001>

<bundles_post_ra>
// kernel: tpu_custom_call.1
= control target key start
LH: loop header
LB: loop body
LE: loop exit
PB: predicated region body
PF: predicated region fallthrough
CT: control target
= control target key end

     0   :  { %s1309_s18 = smov 111   ;;  %v1310_v6 = vmov 0   ;;  %s1502_s0 = inlined_call_operand.vmem [shape: bf16[2,8,384], index: 0, kind: input, shape index: {}]   ;;  %s1503_s1 = inlined_call_operand.vmem [shape: bf16[9,8,8], index: 1, kind: input, shape index: {}]   ;;  %s1504_s2 = inlined_call_operand.vmem [shape: f32[8,1], index: 2, kind: input, shape index: {}]   ;;  %s1505_s3 = inlined_call_operand.hbm [shape: f32[2,8,256], index: 3, kind: output, shape index: {}]  }
   0x1   :  { %v1345_v0 = vld [vmem:[%s1502_s0 + $0x8] ss:$0 sps:$4 sm:$0xff]   ;;  %v39_v1 = vld [vmem:[%s1502_s0] sm:$0xff]  ;;  %v1174_v3 = vld [vmem:[%s1502_s0 + $0xc] sm:$0xff]  ;;  %101 = vmatprep.mubr.bf16.mxu0 %v1310_v6  ;;  %659 = vmatprep.mubr.bf16.mxu1 %v1310_v6 }
   0x2   :  { %v1350_v2 = vcombine.low %v39_v1, %v39_v1  ;;  %53 = vrot.lane.b32.xlu1 %v1345_v0, %s1309_s18  ;;  %v1356_v4 = vcombine.low %v1174_v3, %v1174_v3  ;;  %v1154_v5 = vcombine.high %v39_v1, %v39_v1 }
   0x4   :  { %49 = vrot.lane.b32.xlu0 %v1350_v2, %s1309_s18 }
   0x5   :  { %8 = vsyncpa [#allocation3], 0  ;;  %1278 = vset.pattern.permute.xlu0 %v1310_v6  ;;  %v1283_v7 = vld [vmem:[%s1502_s0 + $0x14] ss:$0 sps:$4 sm:$0xff]   ;;  %v1177_v8 = vcombine.high %v1174_v3, %v1174_v3  ;;  %s1311_s21 = smov 110   ;;  %s1312_s22 = smov 109  }
   0x6   :  { %613 = vrot.lane.b32.xlu1 %v1356_v4, %s1309_s18  ;;  %s1313_s0 = smov 95   ;;  %s1314_s23 = smov 94   ;;  %v16_v9 = vld [vmem:[%s1504_s2] sm:$0xff]  ;;  %vm55_vm0 = vcmask 908288   ;;  %vm62_vm1 = vcmask 1043456   ;;  %vm58_vm2 = vcmask 64512  }
   0x7   :  { %s1315_s24 = smov 93   ;;  %s1316_s25 = smov 79   ;;  %v22_v18 = vld [vmem:[%s1503_s1] sm:$0xf]  ;;  %vm118_vm3 = vcmask 900096   ;;  %vm179_vm4 = vcmask 891904  }
   0x8   :  { %51 = vrot.lane.b32.xlu0 %v1154_v5, %s1309_s18  ;;  %s1317_s26 = smov 78   ;;  %s1318_s27 = smov 77   ;;  %v1145_v31 = vld [vmem:[%s1503_s1 + $0x4] sm:$0xf]  ;;  %v1146_v44 = vld [vmem:[%s1503_s1 + $0x8] sm:$0xf] }
   0x9   :  { %vm240_vm5 = vcmask 777216   ;;  %v1147_v57 = vld [vmem:[%s1503_s1 + $0xc] sm:$0xf]  ;;  %vm301_vm6 = vcmask 769024   ;;  %vm362_vm7 = vcmask 760832   ;;  %vm423_vm8 = vcmask 646144  }
   0xa   :  { %617 = vrot.lane.b32.xlu1 %v1283_v7, %s1309_s18  ;;  %vm484_vm9 = vcmask 637952   ;;  %vm545_vm10 = vcmask 629760   ;;  %s1319_s20 = smov [#allocation2]  }
   0xc   :  { %615 = vrot.lane.b32.xlu0 %v1177_v8, %s1309_s18 }
   0xe   :  { %114 = vrot.lane.b32.xlu1 %v1154_v5, %s1311_s21 }
  0x10   :  { %112 = vrot.lane.b32.xlu0 %v1350_v2, %s1311_s21 }
  0x12   :  { %670 = vrot.lane.b32.xlu1 %v1356_v4, %s1311_s21 }
  0x14   :  { %116 = vrot.lane.b32.xlu0 %v1345_v0, %s1311_s21 }
  0x16   :  { %674 = vrot.lane.b32.xlu1 %v1283_v7, %s1311_s21 }
  0x18   :  { %672 = vrot.lane.b32.xlu0 %v1177_v8, %s1311_s21 }
  0x1a   :  { %175 = vrot.lane.b32.xlu1 %v1154_v5, %s1312_s22 }
  0x1c   :  { %173 = vrot.lane.b32.xlu0 %v1350_v2, %s1312_s22 }
  0x1e   :  { %727 = vrot.lane.b32.xlu1 %v1356_v4, %s1312_s22 }
  0x20   :  { %177 = vrot.lane.b32.xlu0 %v1345_v0, %s1312_s22 }
  0x22   :  { %731 = vrot.lane.b32.xlu1 %v1283_v7, %s1312_s22 }
  0x24   :  { %729 = vrot.lane.b32.xlu0 %v1177_v8, %s1312_s22 }
  0x26   :  { %236 = vrot.lane.b32.xlu1 %v1154_v5, %s1313_s0 }
  0x28   :  { %234 = vrot.lane.b32.xlu0 %v1350_v2, %s1313_s0 }
  0x2a   :  { %784 = vrot.lane.b32.xlu1 %v1356_v4, %s1313_s0 }
  0x2c   :  { %238 = vrot.lane.b32.xlu0 %v1345_v0, %s1313_s0 }
  0x2e   :  { %788 = vrot.lane.b32.xlu1 %v1283_v7, %s1313_s0 }
  0x30   :  { %786 = vrot.lane.b32.xlu0 %v1177_v8, %s1313_s0 }
  0x32   :  { %297 = vrot.lane.b32.xlu1 %v1154_v5, %s1314_s23 }
  0x34   :  { %295 = vrot.lane.b32.xlu0 %v1350_v2, %s1314_s23 }
  0x36   :  { %841 = vrot.lane.b32.xlu1 %v1356_v4, %s1314_s23 }
  0x38   :  { %299 = vrot.lane.b32.xlu0 %v1345_v0, %s1314_s23 }
  0x3a   :  { %845 = vrot.lane.b32.xlu1 %v1283_v7, %s1314_s23 }
  0x3c   :  { %843 = vrot.lane.b32.xlu0 %v1177_v8, %s1314_s23 }
  0x3e   :  { %358 = vrot.lane.b32.xlu1 %v1154_v5, %s1315_s24 }
  0x40   :  { %356 = vrot.lane.b32.xlu0 %v1350_v2, %s1315_s24 }
  0x42   :  { %898 = vrot.lane.b32.xlu1 %v1356_v4, %s1315_s24 }
  0x44   :  { %360 = vrot.lane.b32.xlu0 %v1345_v0, %s1315_s24 }
  0x46   :  { %902 = vrot.lane.b32.xlu1 %v1283_v7, %s1315_s24 }
  0x48   :  { %900 = vrot.lane.b32.xlu0 %v1177_v8, %s1315_s24 }
  0x4a   :  { %419 = vrot.lane.b32.xlu1 %v1154_v5, %s1316_s25 }
  0x4c   :  { %417 = vrot.lane.b32.xlu0 %v1350_v2, %s1316_s25 }
  0x4e   :  { %955 = vrot.lane.b32.xlu1 %v1356_v4, %s1316_s25 }
  0x50   :  { %421 = vrot.lane.b32.xlu0 %v1345_v0, %s1316_s25 }
  0x52   :  { %959 = vrot.lane.b32.xlu1 %v1283_v7, %s1316_s25 }
  0x54   :  { %957 = vrot.lane.b32.xlu0 %v1177_v8, %s1316_s25 }
  0x56   :  { %480 = vrot.lane.b32.xlu1 %v1154_v5, %s1317_s26 }
  0x58   :  { %478 = vrot.lane.b32.xlu0 %v1350_v2, %s1317_s26 }
  0x5a   :  { %1012 = vrot.lane.b32.xlu1 %v1356_v4, %s1317_s26 }
  0x5c   :  { %482 = vrot.lane.b32.xlu0 %v1345_v0, %s1317_s26 }
  0x5e   :  { %1016 = vrot.lane.b32.xlu1 %v1283_v7, %s1317_s26 }
  0x60   :  { %1014 = vrot.lane.b32.xlu0 %v1177_v8, %s1317_s26 }
  0x62   :  { %541 = vrot.lane.b32.xlu1 %v1154_v5, %s1318_s27 }
  0x64   :  { %539 = vrot.lane.b32.xlu0 %v1350_v2, %s1318_s27 }
  0x66   :  { %1069 = vrot.lane.b32.xlu1 %v1356_v4, %s1318_s27 }
  0x68   :  { %543 = vrot.lane.b32.xlu0 %v1345_v0, %s1318_s27 }
  0x6a   :  { %1073 = vrot.lane.b32.xlu1 %v1283_v7, %s1318_s27  ;;  %v1148_v7 = vld [vmem:[%s1503_s1 + $0x10] sm:$0xf] }
  0x6c   :  { %1071 = vrot.lane.b32.xlu0 %v1177_v8, %s1318_s27 }
  0x70   :  { %19 = vperm.xlu0 %1278, %v16_v9  }
  0x74   :  { %v54_v10 = vpop.permute.xlu1 %53 }
  0x76   :  { %v50_v11 = vpop.permute.xlu0 %49 }
  0x78   :  { %v614_v12 = vpop.permute.xlu1 %613 }
  0x7a   :  { %v52_v13 = vpop.permute.xlu0 %51 }
  0x7b   :  { %v57_v14 = vsel %vm55_vm0, %v52_v13, %v54_v10  ;;  %v56_v15 = vsel %vm55_vm0, %v50_v11, %v52_v13 }
  0x7c   :  { %1156 = vmatprep.subr.msk.bf16.mxu0 %vm62_vm1, %v57_v14  ;;  %v64_v16 = vsel %vm62_vm1, %v56_v15, 0  ;;  %v618_v17 = vpop.permute.xlu1 %617 }
  0x7d   :  { %70 = vmatpush1.bf16.msra.mxu0 %v64_v16 }
  0x7e   :  { %v616_v19 = vpop.permute.xlu0 %615 }
  0x7f   :  { %v620_v20 = vsel %vm55_vm0, %v616_v19, %v618_v17  ;;  %v619_v21 = vsel %vm55_vm0, %v614_v12, %v616_v19 }
  0x80   :  { %1157 = vmatmul.mubr.msk.bf16.vlgmr.msra.gmra.mrb[0].mxu0 %vm58_vm2, %v22_v18  ;;  %1179 = vmatprep.subr.msk.bf16.mxu1 %vm62_vm1, %v620_v20  ;;  %v622_v22 = vsel %vm62_vm1, %v619_v21, 0  ;;  %v115_v23 = vpop.permute.xlu1 %114  ;;  %v1149_v20 = vld [vmem:[%s1503_s1 + $0x14] sm:$0xf] }
  0x81   :  { %628 = vmatpush1.bf16.msra.mxu1 %v622_v22  ;;  %162 = vmatprep.mubr.bf16.mxu0 %v1310_v6 }
  0x82   :  { %v113_v24 = vpop.permute.xlu0 %112 }
  0x83   :  { %v119_v25 = vsel %vm118_vm3, %v113_v24, %v115_v23 }
  0x84   :  { %1180 = vmatmul.mubr.msk.bf16.vlgmr.msra.gmra.mrb[0].mxu1 %vm58_vm2, %v22_v18  ;;  %v671_v26 = vpop.permute.xlu1 %670  ;;  %v125_v29 = vsel %vm62_vm1, %v119_v25, 0 }
  0x85   :  { %716 = vmatprep.mubr.bf16.mxu1 %v1310_v6 }
  0x86   :  { %v117_v27 = vpop.permute.xlu0 %116 }
  0x87   :  { %v120_v28 = vsel %vm118_vm3, %v115_v23, %v117_v27 }
  0x88   :  { %1158 = vmatprep.subr.msk.bf16.mxu0 %vm62_vm1, %v120_v28  ;;  %v675_v30 = vpop.permute.xlu1 %674 }
  0x89   :  { %131 = vmatpush1.bf16.msra.mxu0 %v125_v29 }
  0x8a   :  { %v673_v32 = vpop.permute.xlu0 %672 }
  0x8b   :  { %v676_v33 = vsel %vm118_vm3, %v671_v26, %v673_v32  ;;  %v677_v34 = vsel %vm118_vm3, %v673_v32, %v675_v30 }
  0x8c   :  { %v679_v35 = vsel %vm62_vm1, %v676_v33, 0  ;;  %1159 = vmatmul.mubr.msk.bf16.vlgmr.msra.gmra.mrb[0].mxu0 %vm58_vm2, %v1145_v31  ;;  %1181 = vmatprep.subr.msk.bf16.mxu1 %vm62_vm1, %v677_v34  ;;  %v176_v36 = vpop.permute.xlu1 %175  ;;  %v1150_v33 = vld [vmem:[%s1503_s1 + $0x18] sm:$0xf] }
  0x8d   :  { %685 = vmatpush1.bf16.msra.mxu1 %v679_v35  ;;  %223 = vmatprep.mubr.bf16.mxu0 %v1310_v6 }
  0x8e   :  { %v174_v37 = vpop.permute.xlu0 %173 }
  0x8f   :  { %v180_v38 = vsel %vm179_vm4, %v174_v37, %v176_v36 }
  0x90   :  { %1182 = vmatmul.mubr.msk.bf16.vlgmr.msra.gmra.mrb[0].mxu1 %vm58_vm2, %v1145_v31  ;;  %v728_v39 = vpop.permute.xlu1 %727  ;;  %v186_v42 = vsel %vm62_vm1, %v180_v38, 0 }
  0x91   :  { %773 = vmatprep.mubr.bf16.mxu1 %v1310_v6 }
  0x92   :  { %v178_v40 = vpop.permute.xlu0 %177 }
  0x93   :  { %v181_v41 = vsel %vm179_vm4, %v176_v36, %v178_v40 }
  0x94   :  { %1160 = vmatprep.subr.msk.bf16.mxu0 %vm62_vm1, %v181_v41  ;;  %v732_v43 = vpop.permute.xlu1 %731 }
  0x95   :  { %192 = vmatpush1.bf16.msra.mxu0 %v186_v42 }
  0x96   :  { %v730_v45 = vpop.permute.xlu0 %729 }
  0x97   :  { %v733_v46 = vsel %vm179_vm4, %v728_v39, %v730_v45  ;;  %v734_v47 = vsel %vm179_vm4, %v730_v45, %v732_v43 }
  0x98   :  { %v736_v48 = vsel %vm62_vm1, %v733_v46, 0  ;;  %1161 = vmatmul.mubr.msk.bf16.vlgmr.msra.gmra.mrb[0].mxu0 %vm58_vm2, %v1146_v44  ;;  %1183 = vmatprep.subr.msk.bf16.mxu1 %vm62_vm1, %v734_v47  ;;  %v237_v49 = vpop.permute.xlu1 %236  ;;  %v1151_v46 = vld [vmem:[%s1503_s1 + $0x1c] sm:$0xf] }
  0x99   :  { %742 = vmatpush1.bf16.msra.mxu1 %v736_v48  ;;  %284 = vmatprep.mubr.bf16.mxu0 %v1310_v6 }
  0x9a   :  { %v235_v50 = vpop.permute.xlu0 %234 }
  0x9b   :  { %v241_v51 = vsel %vm240_vm5, %v235_v50, %v237_v49 }
  0x9c   :  { %1184 = vmatmul.mubr.msk.bf16.vlgmr.msra.gmra.mrb[0].mxu1 %vm58_vm2, %v1146_v44  ;;  %v785_v52 = vpop.permute.xlu1 %784  ;;  %v247_v55 = vsel %vm62_vm1, %v241_v51, 0 }
  0x9d   :  { %830 = vmatprep.mubr.bf16.mxu1 %v1310_v6 }
  0x9e   :  { %v239_v53 = vpop.permute.xlu0 %238 }
  0x9f   :  { %v242_v54 = vsel %vm240_vm5, %v237_v49, %v239_v53 }
  0xa0   :  { %1162 = vmatprep.subr.msk.bf16.mxu0 %vm62_vm1, %v242_v54  ;;  %v789_v56 = vpop.permute.xlu1 %788 }
  0xa1   :  { %253 = vmatpush1.bf16.msra.mxu0 %v247_v55 }
  0xa2   :  { %v787_v58 = vpop.permute.xlu0 %786 }
  0xa3   :  { %v790_v59 = vsel %vm240_vm5, %v785_v52, %v787_v58  ;;  %v791_v60 = vsel %vm240_vm5, %v787_v58, %v789_v56 }
  0xa4   :  { %v793_v61 = vsel %vm62_vm1, %v790_v59, 0  ;;  %1163 = vmatmul.mubr.msk.bf16.vlgmr.msra.gmra.mrb[0].mxu0 %vm58_vm2, %v1147_v57  ;;  %1185 = vmatprep.subr.msk.bf16.mxu1 %vm62_vm1, %v791_v60  ;;  %v298_v62 = vpop.permute.xlu1 %297  ;;  %v1152_v59 = vld [vmem:[%s1503_s1 + $0x20] sm:$0xf]  ;;  %s1134_s1 = sshll.u32 %s1319_s20, 4  ;;  %s1135_s1 = int_to_ptr.vmem [resolvable:$true] %s1134_s1 }
  0xa5   :  { %799 = vmatpush1.bf16.msra.mxu1 %v793_v61  ;;  %345 = vmatprep.mubr.bf16.mxu0 %v1310_v6  ;;  %s1285_s21 = scalar_lea.vmem %s1135_s1, 512  ;;  %p1290_p1 = scmp.lt.s32.totalorder %s1135_s1, %s1135_s1 }
  0xa6   :  { %v296_v63 = vpop.permute.xlu0 %295  ;;  %p1286_p0 = scmp.ne.s32.totalorder %s1135_s1, %s1285_s21  ;;  %p1291_p2 = scmp.lt.s32.totalorder %s1285_s21, %s1285_s21 }
  0xa7   :  { %v302_v0 = vsel %vm301_vm6, %v296_v63, %v298_v62 }
  0xa8   :  { %1186 = vmatmul.mubr.msk.bf16.vlgmr.msra.gmra.mrb[0].mxu1 %vm58_vm2, %v1147_v57  ;;  %v842_v1 = vpop.permute.xlu1 %841  ;;  %v308_v4 = vsel %vm62_vm1, %v302_v0, 0  ;;  %p1292_p3 = por %p1291_p2, %p1290_p1 }
  0xa9   :  { %887 = vmatprep.mubr.bf16.mxu1 %v1310_v6 }
  0xaa   :  { %v300_v2 = vpop.permute.xlu0 %299  ;;  %p1293_p4 = pnand %p1292_p3, %p1286_p0 }
  0xab   :  { %v303_v3 = vsel %vm301_vm6, %v298_v62, %v300_v2 }
  0xac   :  { %1164 = vmatprep.subr.msk.bf16.mxu0 %vm62_vm1, %v303_v3  ;;  %v846_v5 = vpop.permute.xlu1 %845 }
  0xad   :  { %314 = vmatpush1.bf16.msra.mxu0 %v308_v4 }
  0xae   :  { %v844_v8 = vpop.permute.xlu0 %843 }
  0xaf   :  { %v847_v9 = vsel %vm301_vm6, %v842_v1, %v844_v8  ;;  %v848_v10 = vsel %vm301_vm6, %v844_v8, %v846_v5 }
  0xb0   :  { %v850_v11 = vsel %vm62_vm1, %v847_v9, 0  ;;  %1165 = vmatmul.mubr.msk.bf16.vlgmr.msra.gmra.mrb[0].mxu0 %vm58_vm2, %v1148_v7  ;;  %1187 = vmatprep.subr.msk.bf16.mxu1 %vm62_vm1, %v848_v10  ;;  %v359_v12 = vpop.permute.xlu1 %358 }
  0xb1   :  { %856 = vmatpush1.bf16.msra.mxu1 %v850_v11  ;;  %406 = vmatprep.mubr.bf16.mxu0 %v1310_v6 }
  0xb2   :  { %v357_v13 = vpop.permute.xlu0 %356 }
  0xb3   :  { %v363_v14 = vsel %vm362_vm7, %v357_v13, %v359_v12 }
  0xb4   :  { %1188 = vmatmul.mubr.msk.bf16.vlgmr.msra.gmra.mrb[0].mxu1 %vm58_vm2, %v1148_v7  ;;  %v899_v15 = vpop.permute.xlu1 %898  ;;  %v369_v18 = vsel %vm62_vm1, %v363_v14, 0 }
  0xb5   :  { %944 = vmatprep.mubr.bf16.mxu1 %v1310_v6 }
  0xb6   :  { %v361_v16 = vpop.permute.xlu0 %360 }
  0xb7   :  { %v364_v17 = vsel %vm362_vm7, %v359_v12, %v361_v16 }
  0xb8   :  { %1166 = vmatprep.subr.msk.bf16.mxu0 %vm62_vm1, %v364_v17  ;;  %v903_v19 = vpop.permute.xlu1 %902 }
  0xb9   :  { %375 = vmatpush1.bf16.msra.mxu0 %v369_v18 }
  0xba   :  { %v901_v21 = vpop.permute.xlu0 %900 }
  0xbb   :  { %v904_v22 = vsel %vm362_vm7, %v899_v15, %v901_v21  ;;  %v905_v23 = vsel %vm362_vm7, %v901_v21, %v903_v19 }
  0xbc   :  { %v907_v24 = vsel %vm62_vm1, %v904_v22, 0  ;;  %1167 = vmatmul.mubr.msk.bf16.vlgmr.msra.gmra.mrb[0].mxu0 %vm58_vm2, %v1149_v20  ;;  %1189 = vmatprep.subr.msk.bf16.mxu1 %vm62_vm1, %v905_v23  ;;  %v420_v25 = vpop.permute.xlu1 %419 }
  0xbd   :  { %913 = vmatpush1.bf16.msra.mxu1 %v907_v24  ;;  %467 = vmatprep.mubr.bf16.mxu0 %v1310_v6 }
  0xbe   :  { %v418_v26 = vpop.permute.xlu0 %417 }
  0xbf   :  { %v424_v27 = vsel %vm423_vm8, %v418_v26, %v420_v25 }
  0xc0   :  { %1190 = vmatmul.mubr.msk.bf16.vlgmr.msra.gmra.mrb[0].mxu1 %vm58_vm2, %v1149_v20  ;;  %v956_v28 = vpop.permute.xlu1 %955  ;;  %v430_v31 = vsel %vm62_vm1, %v424_v27, 0 }
  0xc1   :  { %1001 = vmatprep.mubr.bf16.mxu1 %v1310_v6 }
  0xc2   :  { %v422_v29 = vpop.permute.xlu0 %421 }
  0xc3   :  { %v425_v30 = vsel %vm423_vm8, %v420_v25, %v422_v29 }
  0xc4   :  { %1168 = vmatprep.subr.msk.bf16.mxu0 %vm62_vm1, %v425_v30  ;;  %v960_v32 = vpop.permute.xlu1 %959 }
  0xc5   :  { %436 = vmatpush1.bf16.msra.mxu0 %v430_v31 }
  0xc6   :  { %v958_v34 = vpop.permute.xlu0 %957 }
  0xc7   :  { %v961_v35 = vsel %vm423_vm8, %v956_v28, %v958_v34  ;;  %v962_v36 = vsel %vm423_vm8, %v958_v34, %v960_v32 }
  0xc8   :  { %v964_v37 = vsel %vm62_vm1, %v961_v35, 0  ;;  %1169 = vmatmul.mubr.msk.bf16.vlgmr.msra.gmra.mrb[0].mxu0 %vm58_vm2, %v1150_v33  ;;  %1191 = vmatprep.subr.msk.bf16.mxu1 %vm62_vm1, %v962_v36  ;;  %v481_v38 = vpop.permute.xlu1 %480 }
  0xc9   :  { %970 = vmatpush1.bf16.msra.mxu1 %v964_v37  ;;  %528 = vmatprep.mubr.bf16.mxu0 %v1310_v6 }
  0xca   :  { %v479_v39 = vpop.permute.xlu0 %478 }
  0xcb   :  { %v485_v40 = vsel %vm484_vm9, %v479_v39, %v481_v38 }
  0xcc   :  { %1192 = vmatmul.mubr.msk.bf16.vlgmr.msra.gmra.mrb[0].mxu1 %vm58_vm2, %v1150_v33  ;;  %v1013_v41 = vpop.permute.xlu1 %1012  ;;  %v491_v44 = vsel %vm62_vm1, %v485_v40, 0 }
  0xcd   :  { %1058 = vmatprep.mubr.bf16.mxu1 %v1310_v6 }
  0xce   :  { %v483_v42 = vpop.permute.xlu0 %482 }
  0xcf   :  { %v486_v43 = vsel %vm484_vm9, %v481_v38, %v483_v42 }
  0xd0   :  { %1170 = vmatprep.subr.msk.bf16.mxu0 %vm62_vm1, %v486_v43  ;;  %v1017_v45 = vpop.permute.xlu1 %1016 }
  0xd1   :  { %497 = vmatpush1.bf16.msra.mxu0 %v491_v44 }
  0xd2   :  { %v1015_v47 = vpop.permute.xlu0 %1014 }
  0xd3   :  { %v1018_v48 = vsel %vm484_vm9, %v1013_v41, %v1015_v47  ;;  %v1019_v49 = vsel %vm484_vm9, %v1015_v47, %v1017_v45 }
  0xd4   :  { %v1021_v50 = vsel %vm62_vm1, %v1018_v48, 0  ;;  %1171 = vmatmul.mubr.msk.bf16.vlgmr.msra.gmra.mrb[0].mxu0 %vm58_vm2, %v1151_v46  ;;  %1193 = vmatprep.subr.msk.bf16.mxu1 %vm62_vm1, %v1019_v49  ;;  %v542_v51 = vpop.permute.xlu1 %541 }
  0xd5   :  { %1027 = vmatpush1.bf16.msra.mxu1 %v1021_v50  ;;  %589 = vmatprep.mubr.bf16.mxu0 %v1310_v6 }
  0xd6   :  { %v540_v52 = vpop.permute.xlu0 %539 }
  0xd7   :  { %v546_v53 = vsel %vm545_vm10, %v540_v52, %v542_v51 }
  0xd8   :  { %1194 = vmatmul.mubr.msk.bf16.vlgmr.msra.gmra.mrb[0].mxu1 %vm58_vm2, %v1151_v46  ;;  %v1070_v54 = vpop.permute.xlu1 %1069  ;;  %v552_v57 = vsel %vm62_vm1, %v546_v53, 0 }
  0xd9   :  { %1115 = vmatprep.mubr.bf16.mxu1 %v1310_v6 }
  0xda   :  { %v544_v55 = vpop.permute.xlu0 %543 }
  0xdb   :  { %v547_v56 = vsel %vm545_vm10, %v542_v51, %v544_v55 }
  0xdc   :  { %1172 = vmatprep.subr.msk.bf16.mxu0 %vm62_vm1, %v547_v56  ;;  %v1074_v58 = vpop.permute.xlu1 %1073 }
  0xdd   :  { %558 = vmatpush1.bf16.msra.mxu0 %v552_v57 }
  0xde   :  { %v1072_v60 = vpop.permute.xlu0 %1071 }
  0xdf   :  { %v1075_v61 = vsel %vm545_vm10, %v1070_v54, %v1072_v60  ;;  %v1076_v62 = vsel %vm545_vm10, %v1072_v60, %v1074_v58 }
  0xe0   :  { %v1078_v63 = vsel %vm62_vm1, %v1075_v61, 0  ;;  %1173 = vmatmul.mubr.msk.bf16.vlgmr.msra.gmra.mrb[0].mxu0 %vm58_vm2, %v1152_v59  ;;  %1195 = vmatprep.subr.msk.bf16.mxu1 %vm62_vm1, %v1076_v62 }
  0xe1   :  { %1084 = vmatpush1.bf16.msra.mxu1 %v1078_v63 }
  0xe4   :  { %1196 = vmatmul.mubr.msk.bf16.vlgmr.msra.gmra.mrb[0].mxu1 %vm58_vm2, %v1152_v59 }
  0xef   :  { %v20_v6 = vpop.permute.xlu0 %19 }
 0x1b3   :  { %v591_v0 = vpop.f32.mrb[0].mxu0 }
 0x1b4   :  { %v1197_v1 = vadd.f32 %v591_v0, %v20_v6  ;;  %v593_v2 = vpop.f32.mrb[1].mxu0 }
 0x1b5   :  { %v1198_v3 = vadd.f32 %v593_v2, %v20_v6  ;;  %v595_v4 = vpop.f32.mrb[2].mxu0 }
 0x1b6   :  { %600 = vst [vmem:[#allocation2] sm:$0xff] %v1197_v1  ;;  %v596_v5 = vpop.f32.mrb[3].mxu0 }
 0x1b7   :  { %601 = vst [vmem:[#allocation2 + $0x8] sm:$0xff] %v1198_v3  ;;  %v1117_v7 = vpop.f32.mrb[0].mxu1 }
 0x1b8   :  { %v1199_v8 = vadd.f32 %v1117_v7, %v20_v6  ;;  %v1119_v9 = vpop.f32.mrb[1].mxu1 }
 0x1b9   :  { %v1200_v10 = vadd.f32 %v1119_v9, %v20_v6  ;;  %v1121_v11 = vpop.f32.mrb[2].mxu1 }
 0x1ba   :  { %1127 = vst [vmem:[#allocation2 + $0x10] sm:$0xff] %v1199_v8  ;;  %v1122_v12 = vpop.f32.mrb[3].mxu1 }
 0x1bb   :  { %1128 = vst [vmem:[#allocation2 + $0x18] sm:$0xff] %v1200_v10 }
 0x1bc   :  { %1296 = shalt.err (!%p1293_p4)
}
 0x1bd   :  { %s1297_s23 = scalar_lea.hbm %s1505_s3, 512 }
 0x1be   :  { %p1298_p5 = scmp.ne.s32.totalorder %s1505_s3, %s1297_s23  ;;  %p1301_p6 = scmp.lt.u32.totalorder %s1297_s23, %s1505_s3 }
 0x1c0   :  { %p1303_p7 = pnand %p1301_p6, %p1298_p5 }
 0x1c2   :  { %1306 = shalt.err (!%p1303_p7)
}
 0x1c3   :  { %s1320_s28 = smov 256   ;;  %s1321_s29 = smov 16  }
 0x1c4   :  { %1140 = dma.vmem_to_hbm [thread:$0]  %s1135_s1, 512, %s1505_s3, [#allocation3], %s1320_s28, %s1320_s28, %s1321_s29  }
 0x1c5   :  { %1307 = dma.done.wait [#allocation3], 512  }
 0x1c6   :  { %1308 = vsyncadd [#allocation3], 4294966784 }
 0x1c7   :  { %1144 = vsyncpa [#allocation3], 1 }

</bundles_post_ra>
